<compile_context>
chip_gen: v7x
topology: tpu7x:2x2x1
jax: 0.10.0
libtpu: 0.0.40
codegen_flags: <defaults>
</compile_context>

<pallas_src>
import jax
import jax.numpy as jnp
from jax.experimental import pallas as pl
from jax.experimental.pallas import tpu as pltpu


# ----------------------------- fused Pallas kernel -----------------------------

def _make_fused_kernel(L, kernel_sizes):
    """Whole InceptionBlock for one batch element. NCL layout: (C, L) tiles."""
    K1, K2, K3 = kernel_sizes

    def conv_same(y, w_flat, K):
        # y: (C, L) f32 activation; w_flat: (Cout, K*C) with column order k*C + c.
        C = y.shape[0]
        pad = K - 1                              # SAME, stride=1, dilation=1
        lpad, rpad = pad // 2, pad - pad // 2    # PyTorch: extra zero on the RIGHT
        parts = []
        if lpad:
            parts.append(jnp.zeros((C, lpad), jnp.float32))
        parts.append(y)
        if rpad:
            parts.append(jnp.zeros((C, rpad), jnp.float32))
        yp = jnp.concatenate(parts, axis=1) if len(parts) > 1 else y   # (C, L+pad), VMEM
        # im2col over taps -> one deep contraction on the MXU.
        lhs = jnp.concatenate([yp[:, k:k + L] for k in range(K)], axis=0)  # (K*C, L)
        return jnp.dot(w_flat, lhs, preferred_element_type=jnp.float32)    # (Cout, L)

    def kernel(x_ref, wb_ref, w1_ref, w2_ref, w3_ref, wr_ref, shift_ref, o_ref):
        x = x_ref[0].astype(jnp.float32)                                    # (Cin, L)
        # bottleneck 1x1 conv (no bias)
        y = jnp.dot(wb_ref[...], x, preferred_element_type=jnp.float32)    # (Cb, L)
        # three SAME-padded convs, intermediates never leave VMEM
        y = conv_same(y, w1_ref[...], K1)
        y = conv_same(y, w2_ref[...], K2)
        y = conv_same(y, w3_ref[...], K3)
        # residual branch: conv1x1 (BN scale pre-folded) + shift + ReLU, fused add
        r = jnp.dot(wr_ref[...], x, preferred_element_type=jnp.float32)    # (Cout, L)
        r = jnp.maximum(r + shift_ref[...], 0.0)
        o_ref[0] = (y + r).astype(o_ref.dtype)

    return kernel


def inception_block_forward(x_ncl, prepped):
    """x_ncl: (N, Cin, L) in PyTorch NCL layout; returns (N, Cout, L)."""
    N, Cin, L = x_ncl.shape
    wb = prepped["wb"]
    w1, w2, w3 = prepped["convs"]
    wr = prepped["wr"]
    shift = prepped["shift"]
    Cout = wr.shape[0]
    kernel = _make_fused_kernel(L, prepped["ksizes"])

    return pl.pallas_call(
        kernel,
        out_shape=jax.ShapeDtypeStruct((N, Cout, L), x_ncl.dtype),
        grid=(N,),
        in_specs=[
            pl.BlockSpec((1, Cin, L), lambda n: (n, 0, 0)),
            pl.BlockSpec(wb.shape, lambda n: (0, 0)),
            pl.BlockSpec(w1.shape, lambda n: (0, 0)),
            pl.BlockSpec(w2.shape, lambda n: (0, 0)),
            pl.BlockSpec(w3.shape, lambda n: (0, 0)),
            pl.BlockSpec(wr.shape, lambda n: (0, 0)),
            pl.BlockSpec(shift.shape, lambda n: (0, 0)),
        ],
        out_specs=pl.BlockSpec((1, Cout, L), lambda n: (n, 0, 0)),
        compiler_params=pltpu.CompilerParams(
            dimension_semantics=("parallel",),        # batch axis across TCs (v7x)
            vmem_limit_bytes=32 * 1024 * 1024,
        ),
    )(x_ncl, wb, w1, w2, w3, wr, shift)


# -------------------------- parameters & one-time prep --------------------------

def init_params(key, in_channels, out_channels, bottleneck_channels, kernel_size):
    ks = [kernel_size // (2 ** i) for i in range(3)]
    keys = jax.random.split(key, 5)
    w = lambda k, shape: jax.random.normal(k, shape, jnp.float32) * 0.1
    chans = [bottleneck_channels] + [out_channels] * 3
    return {
        # PyTorch Conv1d weight layout: (out_channels, in_channels, kernel)
        "bottleneck": w(keys[0], (bottleneck_channels, in_channels, 1)),
        "convs": [w(keys[1 + i], (chans[i + 1], chans[i], ks[i])) for i in range(3)],
        "residual_conv": w(keys[4], (out_channels, in_channels, 1)),
        # BatchNorm1d (eval mode / running stats): gamma=1, beta=0, mean=0, var=1
        "bn_gamma": jnp.ones((out_channels,), jnp.float32),
        "bn_beta": jnp.zeros((out_channels,), jnp.float32),
        "bn_mean": jnp.zeros((out_channels,), jnp.float32),
        "bn_var": jnp.ones((out_channels,), jnp.float32),
    }


def prepare_params(params, eps=1e-5):
    """One-time weight prep (hoisted out of the forward pass)."""
    wb = params["bottleneck"][:, :, 0]                       # (Cb, Cin)
    conv_ws = []
    ksizes = []
    for w in params["convs"]:                                # (Cout, Cin_i, K)
        cout, ci, k = w.shape
        # flatten to (Cout, K*Cin_i) with column index k*Cin_i + c  (matches im2col)
        conv_ws.append(jnp.transpose(w, (0, 2, 1)).reshape(cout, k * ci))
        ksizes.append(int(k))
    scale = params["bn_gamma"] / jnp.sqrt(params["bn_var"] + eps)
    wr = params["residual_conv"][:, :, 0] * scale[:, None]   # fold BN scale into weight
    shift = (params["bn_beta"] - params["bn_mean"] * scale)[:, None]   # (Cout, 1)
    return {"wb": wb, "convs": conv_ws, "wr": wr, "shift": shift,
            "ksizes": tuple(ksizes)}


# ------------------------------ pure-JAX reference ------------------------------

def _ref_conv1d_same(x_ncl, w_oik):
    k = w_oik.shape[2]
    L = x_ncl.shape[2]
    padding = (L - 1) - L + (k - 1) + 1
    if padding % 2 != 0:
        x_ncl = jnp.pad(x_ncl, ((0, 0), (0, 0), (0, 1)))
    p = padding // 2
    return jax.lax.conv_general_dilated(
        x_ncl, w_oik, window_strides=(1,), padding=[(p, p)],
        dimension_numbers=("NCH", "OIH", "NCH"))


def reference_forward(x_ncl, params):
    org = x_ncl
    x = _ref_conv1d_same(x_ncl, params["bottleneck"])
    for w in params["convs"]:
        x = _ref_conv1d_same(x, w)
    eps = 1e-5
    scale = params["bn_gamma"] / jnp.sqrt(params["bn_var"] + eps)
    shift = params["bn_beta"] - params["bn_mean"] * scale
    r = _ref_conv1d_same(org, params["residual_conv"])
    r = jnp.maximum(r * scale[None, :, None] + shift[None, :, None], 0.0)
    return x + r


# --------------------------------- main -----------------------------------------

if __name__ == "__main__":
    key = jax.random.PRNGKey(0)
    kx, kp = jax.random.split(key)
    N, Cin, L = 2, 4, 16
    Cout, Cb, ksize = 8, 8, 9          # conv kernel sizes used: [9, 4, 2]
    x = jax.random.normal(kx, (N, Cin, L), jnp.float32)

    params = init_params(kp, Cin, Cout, Cb, ksize)
    prepped = prepare_params(params)

    out = jax.block_until_ready(inception_block_forward(x, prepped))
    ref = jax.block_until_ready(reference_forward(x, params))

    assert out.shape == (N, Cout, L), out.shape
    if not jnp.allclose(out, ref, rtol=1e-4, atol=1e-5):
        raise AssertionError("Pallas output does not match reference")
    print("KERNEL_OK")
</pallas_src>

<mosaic_0001>
module attributes {stable_mosaic.version = 11 : i64} {
  func.func @kernel(%arg0: i32, %arg1: memref<1x4x16xf32, #tpu.memory_space<vmem>>, %arg2: memref<8x4xf32, #tpu.memory_space<vmem>>, %arg3: memref<8x72xf32, #tpu.memory_space<vmem>>, %arg4: memref<8x32xf32, #tpu.memory_space<vmem>>, %arg5: memref<8x16xf32, #tpu.memory_space<vmem>>, %arg6: memref<8x4xf32, #tpu.memory_space<vmem>>, %arg7: memref<8x1xf32, #tpu.memory_space<vmem>>, %arg8: memref<1x8x16xf32, #tpu.memory_space<vmem>>) attributes {dimension_semantics = [#tpu.dimension_semantics<parallel>], iteration_bounds = array<i64: 2>, scalar_prefetch = 0 : i64, scratch_operands = 0 : i64, tpu.core_type = #tpu.core_type<tc>, window_params = [{transform_indices = @transform_0, window_bounds = array<i64: 1, 4, 16>}, {pipeline_mode = #tpu.pipeline_mode<synchronous>, transform_indices = @transform_1, window_bounds = array<i64: 8, 4>}, {pipeline_mode = #tpu.pipeline_mode<synchronous>, transform_indices = @transform_2, window_bounds = array<i64: 8, 72>}, {pipeline_mode = #tpu.pipeline_mode<synchronous>, transform_indices = @transform_3, window_bounds = array<i64: 8, 32>}, {pipeline_mode = #tpu.pipeline_mode<synchronous>, transform_indices = @transform_4, window_bounds = array<i64: 8, 16>}, {pipeline_mode = #tpu.pipeline_mode<synchronous>, transform_indices = @transform_5, window_bounds = array<i64: 8, 4>}, {pipeline_mode = #tpu.pipeline_mode<synchronous>, transform_indices = @transform_6, window_bounds = array<i64: 8, 1>}, {transform_indices = @transform_7, window_bounds = array<i64: 1, 8, 16>}]} {
    %c0 = arith.constant 0 : index
    %c0_0 = arith.constant 0 : index
    %c0_1 = arith.constant 0 : index
    %0 = vector.load %arg1[%c0, %c0_0, %c0_1] : memref<1x4x16xf32, #tpu.memory_space<vmem>>, vector<1x4x16xf32>
    %1 = vector.shape_cast %0 : vector<1x4x16xf32> to vector<4x16xf32>
    %c0_2 = arith.constant 0 : index
    %c0_3 = arith.constant 0 : index
    %2 = vector.load %arg2[%c0_2, %c0_3] : memref<8x4xf32, #tpu.memory_space<vmem>>, vector<8x4xf32>
    %cst = arith.constant dense<0.000000e+00> : vector<8x16xf32>
    %3 = tpu.matmul %2, %1, %cst {dimension_numbers = #tpu.dot_dimension_numbers<[1], [0], [0], [1], [0, 0, 1, 1], [], []>} : vector<8x4xf32>, vector<4x16xf32>, vector<8x16xf32> -> vector<8x16xf32>
    %c0_4 = arith.constant 0 : index
    %c0_5 = arith.constant 0 : index
    %4 = vector.load %arg3[%c0_4, %c0_5] : memref<8x72xf32, #tpu.memory_space<vmem>>, vector<8x72xf32>
    %cst_6 = arith.constant 0.000000e+00 : f32
    %5 = vector.broadcast %cst_6 : f32 to vector<8x4xf32>
    %cst_7 = arith.constant 0.000000e+00 : f32
    %6 = vector.broadcast %cst_7 : f32 to vector<8x4xf32>
    %7 = tpu.concatenate %5, %3, %6 in 1 : vector<8x4xf32>, vector<8x16xf32>, vector<8x4xf32> -> vector<8x24xf32>
    %8 = vector.extract_strided_slice %7 {offsets = [0, 0], sizes = [8, 16], strides = [1, 1]} : vector<8x24xf32> to vector<8x16xf32>
    %9 = vector.extract_strided_slice %7 {offsets = [0, 1], sizes = [8, 16], strides = [1, 1]} : vector<8x24xf32> to vector<8x16xf32>
    %10 = vector.extract_strided_slice %7 {offsets = [0, 2], sizes = [8, 16], strides = [1, 1]} : vector<8x24xf32> to vector<8x16xf32>
    %11 = vector.extract_strided_slice %7 {offsets = [0, 3], sizes = [8, 16], strides = [1, 1]} : vector<8x24xf32> to vector<8x16xf32>
    %12 = vector.extract_strided_slice %7 {offsets = [0, 4], sizes = [8, 16], strides = [1, 1]} : vector<8x24xf32> to vector<8x16xf32>
    %13 = vector.extract_strided_slice %7 {offsets = [0, 5], sizes = [8, 16], strides = [1, 1]} : vector<8x24xf32> to vector<8x16xf32>
    %14 = vector.extract_strided_slice %7 {offsets = [0, 6], sizes = [8, 16], strides = [1, 1]} : vector<8x24xf32> to vector<8x16xf32>
    %15 = vector.extract_strided_slice %7 {offsets = [0, 7], sizes = [8, 16], strides = [1, 1]} : vector<8x24xf32> to vector<8x16xf32>
    %16 = vector.extract_strided_slice %7 {offsets = [0, 8], sizes = [8, 16], strides = [1, 1]} : vector<8x24xf32> to vector<8x16xf32>
    %17 = tpu.concatenate %8, %9, %10, %11, %12, %13, %14, %15, %16 in 0 : vector<8x16xf32>, vector<8x16xf32>, vector<8x16xf32>, vector<8x16xf32>, vector<8x16xf32>, vector<8x16xf32>, vector<8x16xf32>, vector<8x16xf32>, vector<8x16xf32> -> vector<72x16xf32>
    %cst_8 = arith.constant dense<0.000000e+00> : vector<8x16xf32>
    %18 = tpu.matmul %4, %17, %cst_8 {dimension_numbers = #tpu.dot_dimension_numbers<[1], [0], [0], [1], [0, 0, 1, 1], [], []>} : vector<8x72xf32>, vector<72x16xf32>, vector<8x16xf32> -> vector<8x16xf32>
    %c0_9 = arith.constant 0 : index
    %c0_10 = arith.constant 0 : index
    %19 = vector.load %arg4[%c0_9, %c0_10] : memref<8x32xf32, #tpu.memory_space<vmem>>, vector<8x32xf32>
    %cst_11 = arith.constant 0.000000e+00 : f32
    %20 = vector.broadcast %cst_11 : f32 to vector<8x1xf32>
    %cst_12 = arith.constant 0.000000e+00 : f32
    %21 = vector.broadcast %cst_12 : f32 to vector<8x2xf32>
    %22 = tpu.concatenate %20, %18, %21 in 1 : vector<8x1xf32>, vector<8x16xf32>, vector<8x2xf32> -> vector<8x19xf32>
    %23 = vector.extract_strided_slice %22 {offsets = [0, 0], sizes = [8, 16], strides = [1, 1]} : vector<8x19xf32> to vector<8x16xf32>
    %24 = vector.extract_strided_slice %22 {offsets = [0, 1], sizes = [8, 16], strides = [1, 1]} : vector<8x19xf32> to vector<8x16xf32>
    %25 = vector.extract_strided_slice %22 {offsets = [0, 2], sizes = [8, 16], strides = [1, 1]} : vector<8x19xf32> to vector<8x16xf32>
    %26 = vector.extract_strided_slice %22 {offsets = [0, 3], sizes = [8, 16], strides = [1, 1]} : vector<8x19xf32> to vector<8x16xf32>
    %27 = tpu.concatenate %23, %24, %25, %26 in 0 : vector<8x16xf32>, vector<8x16xf32>, vector<8x16xf32>, vector<8x16xf32> -> vector<32x16xf32>
    %cst_13 = arith.constant dense<0.000000e+00> : vector<8x16xf32>
    %28 = tpu.matmul %19, %27, %cst_13 {dimension_numbers = #tpu.dot_dimension_numbers<[1], [0], [0], [1], [0, 0, 1, 1], [], []>} : vector<8x32xf32>, vector<32x16xf32>, vector<8x16xf32> -> vector<8x16xf32>
    %c0_14 = arith.constant 0 : index
    %c0_15 = arith.constant 0 : index
    %29 = vector.load %arg5[%c0_14, %c0_15] : memref<8x16xf32, #tpu.memory_space<vmem>>, vector<8x16xf32>
    %cst_16 = arith.constant 0.000000e+00 : f32
    %30 = vector.broadcast %cst_16 : f32 to vector<8x1xf32>
    %31 = tpu.concatenate %28, %30 in 1 : vector<8x16xf32>, vector<8x1xf32> -> vector<8x17xf32>
    %32 = vector.extract_strided_slice %31 {offsets = [0, 0], sizes = [8, 16], strides = [1, 1]} : vector<8x17xf32> to vector<8x16xf32>
    %33 = vector.extract_strided_slice %31 {offsets = [0, 1], sizes = [8, 16], strides = [1, 1]} : vector<8x17xf32> to vector<8x16xf32>
    %34 = tpu.concatenate %32, %33 in 0 : vector<8x16xf32>, vector<8x16xf32> -> vector<16x16xf32>
    %cst_17 = arith.constant dense<0.000000e+00> : vector<8x16xf32>
    %35 = tpu.matmul %29, %34, %cst_17 {dimension_numbers = #tpu.dot_dimension_numbers<[1], [0], [0], [1], [0, 0, 1, 1], [], []>} : vector<8x16xf32>, vector<16x16xf32>, vector<8x16xf32> -> vector<8x16xf32>
    %c0_18 = arith.constant 0 : index
    %c0_19 = arith.constant 0 : index
    %36 = vector.load %arg6[%c0_18, %c0_19] : memref<8x4xf32, #tpu.memory_space<vmem>>, vector<8x4xf32>
    %cst_20 = arith.constant dense<0.000000e+00> : vector<8x16xf32>
    %37 = tpu.matmul %36, %1, %cst_20 {dimension_numbers = #tpu.dot_dimension_numbers<[1], [0], [0], [1], [0, 0, 1, 1], [], []>} : vector<8x4xf32>, vector<4x16xf32>, vector<8x16xf32> -> vector<8x16xf32>
    %c0_21 = arith.constant 0 : index
    %c0_22 = arith.constant 0 : index
    %38 = vector.load %arg7[%c0_21, %c0_22] : memref<8x1xf32, #tpu.memory_space<vmem>>, vector<8x1xf32>
    %39 = vector.broadcast %38 : vector<8x1xf32> to vector<8x16xf32>
    %40 = arith.addf %37, %39 : vector<8x16xf32>
    %cst_23 = arith.constant 0.000000e+00 : f32
    %41 = vector.broadcast %cst_23 : f32 to vector<8x16xf32>
    %42 = arith.maximumf %40, %41 : vector<8x16xf32>
    %43 = arith.addf %35, %42 : vector<8x16xf32>
    %c0_24 = arith.constant 0 : index
    %c0_25 = arith.constant 0 : index
    %c0_26 = arith.constant 0 : index
    %44 = vector.load %arg8[%c0_24, %c0_25, %c0_26] : memref<1x8x16xf32, #tpu.memory_space<vmem>>, vector<1x8x16xf32>
    %45 = vector.shape_cast %44 : vector<1x8x16xf32> to vector<8x16xf32>
    %46 = vector.shape_cast %43 : vector<8x16xf32> to vector<1x8x16xf32>
    tpu.vector_store %arg8[%c0_24, %c0_25, %c0_26], %46 {strides = array<i32>} : memref<1x8x16xf32, #tpu.memory_space<vmem>>, vector<1x8x16xf32>,
    return
  }
  func.func @transform_0(%arg0: i32) -> (i32, i32, i32) {
    %c0_i32 = arith.constant 0 : i32
    %c0_i32_0 = arith.constant 0 : i32
    %c0_i32_1 = arith.constant 0 : i32
    return %arg0, %c0_i32, %c0_i32_0 : i32, i32, i32
  }
  func.func @transform_1(%arg0: i32) -> (i32, i32) {
    %c0_i32 = arith.constant 0 : i32
    %c0_i32_0 = arith.constant 0 : i32
    %c0_i32_1 = arith.constant 0 : i32
    return %c0_i32, %c0_i32_0 : i32, i32
  }
  func.func @transform_2(%arg0: i32) -> (i32, i32) {
    %c0_i32 = arith.constant 0 : i32
    %c0_i32_0 = arith.constant 0 : i32
    %c0_i32_1 = arith.constant 0 : i32
    return %c0_i32, %c0_i32_0 : i32, i32
  }
  func.func @transform_3(%arg0: i32) -> (i32, i32) {
    %c0_i32 = arith.constant 0 : i32
    %c0_i32_0 = arith.constant 0 : i32
    %c0_i32_1 = arith.constant 0 : i32
    return %c0_i32, %c0_i32_0 : i32, i32
  }
  func.func @transform_4(%arg0: i32) -> (i32, i32) {
    %c0_i32 = arith.constant 0 : i32
    %c0_i32_0 = arith.constant 0 : i32
    %c0_i32_1 = arith.constant 0 : i32
    return %c0_i32, %c0_i32_0 : i32, i32
  }
  func.func @transform_5(%arg0: i32) -> (i32, i32) {
    %c0_i32 = arith.constant 0 : i32
    %c0_i32_0 = arith.constant 0 : i32
    %c0_i32_1 = arith.constant 0 : i32
    return %c0_i32, %c0_i32_0 : i32, i32
  }
  func.func @transform_6(%arg0: i32) -> (i32, i32) {
    %c0_i32 = arith.constant 0 : i32
    %c0_i32_0 = arith.constant 0 : i32
    %c0_i32_1 = arith.constant 0 : i32
    return %c0_i32, %c0_i32_0 : i32, i32
  }
  func.func @transform_7(%arg0: i32) -> (i32, i32, i32) {
    %c0_i32 = arith.constant 0 : i32
    %c0_i32_0 = arith.constant 0 : i32
    %c0_i32_1 = arith.constant 0 : i32
    return %arg0, %c0_i32, %c0_i32_0 : i32, i32, i32
  }
}

</mosaic_0001>

<bundles_post_ra>
// kernel: tpu_custom_call.1
= control target key start
LH: loop header
LB: loop body
LE: loop exit
PB: predicated region body
PF: predicated region fallthrough
CT: control target
= control target key end

     0   :  { %12 = vsyncpa [#allocation3], 0  ;;  %s1242_s0 = inlined_call_operand.vmem [shape: f32[2,4,16], index: 0, kind: input, shape index: {}]   ;;  %s1243_s1 = inlined_call_operand.vmem [shape: f32[8,4], index: 1, kind: input, shape index: {}]   ;;  %s1244_s2 = inlined_call_operand.vmem [shape: f32[8,72], index: 2, kind: input, shape index: {}]   ;;  %s1245_s3 = inlined_call_operand.vmem [shape: f32[8,32], index: 3, kind: input, shape index: {}]   ;;  %s1246_s4 = inlined_call_operand.vmem [shape: f32[8,16], index: 4, kind: input, shape index: {}]   ;;  %s1247_s5 = inlined_call_operand.vmem [shape: f32[8,4], index: 5, kind: input, shape index: {}]   ;;  %s1248_s6 = inlined_call_operand.vmem [shape: f32[8,1], index: 6, kind: input, shape index: {}]   ;;  %s1249_s7 = inlined_call_operand.hbm [shape: f32[2,8,16], index: 7, kind: output, shape index: {}]  }
   0x1   :  { %14 = vsyncpa [#allocation3 + $0x1], 0  ;;  %s1079_s24 = smov 0   ;;  %s1081_s25 = smov 0  }
   0x2   :  { %s1083_s26 = smov 0   ;;  %s1085_s27 = smov 0  }
   0x3 LB: > { %s1100_s28 = sadd.s32 4294967295, %s1021_s27   ;;  %s789_s29 = sadd.s32 4294967294, %s1021_s27   ;;  %s1021_s27 = sphi %s1085_s27, %s1255_s27   ;;  %s1017_s26 = sphi %s1083_s26, %s1254_s26   ;;  %s1013_s25 = sphi %s1081_s25, %s1253_s25   ;;  %s1009_s24 = sphi %s1079_s24, %s1252_s24  }
   0x4   : > { %s1104_s30 = sadd.s32 1, %s1021_s27   ;;  %s179_s8 = sadd.s32 1, %s1017_s26 }
   0x5   : > { %s176_s9 = ssub.s32 %s1021_s27, %s1104_s30  ;;  %p189_p0 = scmp.ne.s32.totalorder %s1017_s26, %s1013_s25 }
   0x6   : > { %p177_p1 = scmp.eq.s32.totalorder %s176_s9, 0  ;;  %p190_p2 = scmp.eq.s32.totalorder %s1100_s28, 1 }
   0x7   : > { %p195_p3 = scmp.ne.s32.totalorder %s1013_s25, %s1009_s24  ;;  %p196_p4 = scmp.eq.s32.totalorder %s789_s29, 1 }
   0x8   : > { %s1115_s10 = scalar_select %p177_p1, %s1017_s26, %s179_s8  }
   0x9   : > { %p1117_p5 = por %p190_p2, %p189_p0  ;;  %p1121_p6 = por %p196_p4, %p195_p3 }
   0xa   : > { %p792_p7 = scmp.ge.s32.totalorder %s1021_s27, 1  ;;  %p239_p8 = scmp.lt.s32.totalorder %s1021_s27, 3 }
   0xc   : > { %p240_p9 = pnand %p792_p7, %p239_p8 }
   0xd   : > { %p270_p10 = scmp.lt.s32.totalorder (!%p240_p9), %s1100_s28, 1  ;;  %v1023_v0 = vmov (!%p240_p9), 0.0   ;;  %vm1024_vm0 = vmmov (!%p240_p9), 0   ;;  %vm280_vm1 = vcmask (!%p240_p9), 1043456   ;;  %v275_v1 = vld [vmem:[%s1243_s1] sm:$0xff] (!%p240_p9)  ;;  %vm276_vm2 = vcmask (!%p240_p9), 31744  }
   0xe   : > { %243 = sbr.rel (%p240_p9) target bundleno = 1504 (0x5e0), region = 48  ;;  %831 = vmatprep.subr.mxu0 (!%p240_p9), %v1023_v0  ;;  %833 = vmatprep.mubr.msk.f32.mxu0 (!%p240_p9), %vm1024_vm0, %v1023_v0  ;;  %s1025_s20 = smov (!%p240_p9), 4   ;;  %v1026_v5 = vmov (!%p240_p9), 0.0|0.0   ;;  %vm360_vm3 = vcmask (!%p240_p9), 162816   ;;  %vm1035_vm4 = vmmov (!%p240_p9), 1   ;;  %v354_v20 = vld [vmem:[%s1244_s2] sm:$0xff] (!%p240_p9) }
   0xf   : > { %854 = vmatprep.mubr.msk.f32.mxu1 (!%p240_p9), %vm1024_vm0, %v1023_v0  ;;  %880 = vmatprep.subr.bf16.mxu1 (!%p240_p9), %v1026_v5  ;;  %s1027_s21 = smov (!%p240_p9), 126   ;;  %s1028_s22 = smov (!%p240_p9), 127   ;;  %vm882_vm5 = vmpackc.low (!%p240_p9), %vm1035_vm4, %vm360_vm3  ;;  %vm387_vm6 = vcmask (!%p240_p9), 588800   ;;  %vm466_vm7 = vcmask (!%p240_p9), 7168   ;;  %vm468_vm8 = vcmask (!%p240_p9), 138240   ;;  %v461_v32 = vld [vmem:[%s1245_s3] sm:$0xff] (!%p240_p9) }
  0x10   : > { %s1029_s23 = smov (!%p240_p9), 125   ;;  %s1030_s29 = smov (!%p240_p9), 124   ;;  %vm895_vm9 = vmpackc.low (!%p240_p9), %vm1035_vm4, %vm468_vm8  ;;  %vm480_vm10 = vcmask (!%p240_p9), 261120   ;;  %v561_v33 = vld [vmem:[%s1247_s5] sm:$0xff] (!%p240_p9)  ;;  %v1037_v35 = vmov (!%p240_p9), 0   ;;  %vm555_vm11 = vcmask (!%p240_p9), 130048  }
  0x11   : > { %s1031_s8 = smov (!%p240_p9), 123   ;;  %s1032_s9 = smov (!%p240_p9), 122   ;;  %v562_v34 = vld [vmem:[%s1248_s6] sm:$0xff] (!%p240_p9)  ;;  %958 = vset.pattern.permute.xlu0 (!%p240_p9), %v1037_v35  ;;  %vm902_vm12 = vmpackc.low (!%p240_p9), %vm1035_vm4, %vm555_vm11 }
  0x12   : > { %v554_v41 = vld [vmem:[%s1246_s4] sm:$0xff] (!%p240_p9) }
  0x15   : > { %s271_s13 = scalar_select %p270_p10, %s1100_s28, 1 }
  0x17   : > { %s794_s14 = sshll.u32 %s271_s13, 2  ;;  %s1033_s13 = smov 121  }
  0x18   : > { %s273_s17 = scalar_lea.vmem %s1242_s0, %s794_s14  ;;  %s1034_s14 = smov 120  }
  0x19   : > { %v1140_v2 = vld [vmem:[%s273_s17] sm:$0xf]  ;;  %s1036_s17 = smov 1  }
  0x1a   : > { %832 = vmatpush3.msk.msra.mxu0 %vm280_vm1, %v1140_v2 }
  0x1b   : > { %834 = vmatmul.mubr.msk.f32.vlgmr.msra.gmra.mrb[0].mxu0 %vm276_vm2, %v275_v1  ;;  %893 = vmatprep.subr.bf16.mxu0 %v1026_v5 }
  0x1c   : > { %865 = vmatprep.mubr.msk.f32.mxu0 %vm1024_vm0, %v1023_v0 }
  0xee   : > { %v350_v3 = vpop.f32.mrb[0].mxu0 }
  0xef   : > { %356 = vrot.lane.b32.xlu0 %v350_v3, %s1025_s20  ;;  %v835_v4 = vpop.f32.mrb[1].mxu0 }
 0x161   : > { %v357_v6 = vpop.permute.xlu0 %356 }
 0x162   : > { %v359_v7 = vsel %vm276_vm2, 0.0, %v357_v6 }
 0x163   : > { %v361_v8 = vsel %vm360_vm3, %v359_v7, 0.0 }
 0x164   : > { %366 = vrot.lane.b32.xlu1 %v361_v8, %s1027_s21  ;;  %363 = vrot.lane.b32.xlu0 %v361_v8, %s1028_s22 }
 0x168   : > { %369 = vrot.lane.b32.xlu1 %v361_v8, %s1029_s23  ;;  %372 = vrot.lane.b32.xlu0 %v361_v8, %s1030_s29 }
 0x16c   : > { %375 = vrot.lane.b32.xlu1 %v361_v8, %s1031_s8  ;;  %378 = vrot.lane.b32.xlu0 %v361_v8, %s1032_s9 }
 0x170   : > { %381 = vrot.lane.b32.xlu1 %v361_v8, %s1033_s13  ;;  %384 = vrot.lane.b32.xlu0 %v361_v8, %s1034_s14  ;;  %s267_s13 = sand.u32 1, %s1013_s25  }
 0x171   : > { %s793_s14 = sshll.u32 %s267_s13, 3  ;;  %s717_s20 = scalar_lea.sflag [#allocation3], %s267_s13 }
 0x172   : > { %s269_s15 = scalar_lea.vmem [#allocation2], %s793_s14 }
 0x173   : > { %s730_s16 = sshll.u32 %s269_s15, 4  ;;  %s1201_s16 = int_to_ptr.vmem [resolvable:$true] %s730_s16 }
 0x1d6   : > { %v367_v9 = vpop.permute.xlu1 %366  ;;  %v364_v10 = vpop.permute.xlu0 %363 }
 0x1d7   : > { %v881_v11 = vpack.c.bf16 %v364_v10, %v359_v7 }
 0x1d9   : > { %883 = vmatpush3.bf16.msk.msra.mxu1 %vm882_vm5, %v881_v11 }
 0x1da   : > { %v370_v12 = vpop.permute.xlu1 %369  ;;  %884 = vmatprep.subr.bf16.mxu1 %v1026_v5  ;;  %v373_v14 = vpop.permute.xlu0 %372 }
 0x1db   : > { %v885_v13 = vpack.c.bf16 %v370_v12, %v367_v9 }
 0x1dd   : > { %886 = vmatpush3.bf16.msra.mxu1 %v885_v13 }
 0x1de   : > { %v376_v15 = vpop.permute.xlu1 %375  ;;  %887 = vmatprep.subr.bf16.mxu1 %v1026_v5  ;;  %v379_v17 = vpop.permute.xlu0 %378 }
 0x1df   : > { %v888_v16 = vpack.c.bf16 %v376_v15, %v373_v14 }
 0x1e1   : > { %889 = vmatpush3.bf16.msra.mxu1 %v888_v16 }
 0x1e2   : > { %v382_v18 = vpop.permute.xlu1 %381  ;;  %890 = vmatprep.subr.bf16.mxu1 %v1026_v5  ;;  %v385_v21 = vpop.permute.xlu0 %384 }
 0x1e3   : > { %v891_v19 = vpack.c.bf16 %v382_v18, %v379_v17 }
 0x1e5   : > { %892 = vmatpush3.bf16.msra.mxu1 %v891_v19 }
 0x1e6   : > { %852 = vmatprep.subr.mxu1 %v1023_v0 }
 0x1e9   : > { %853 = vmatpush3.msra.mxu1 %v385_v21 }
 0x1ea   : > { %855 = vmatmul.mubr.msk.f32.vlgmr.msra.gmra.mrb[0].mxu1 %vm387_vm6, %v354_v20 }
 0x2bd   : > { %v457_v22 = vpop.f32.mrb[0].mxu1 }
 0x2be   : > { %463 = vrot.lane.b32.xlu1 %v457_v22, %s1036_s17  ;;  %v856_v23 = vpop.f32.mrb[1].mxu1 }
 0x330   : > { %v464_v24 = vpop.permute.xlu1 %463 }
 0x331   : > { %v467_v25 = vsel %vm466_vm7, 0.0, %v464_v24 }
 0x332   : > { %v469_v26 = vsel %vm468_vm8, %v467_v25, 0.0 }
 0x333   : > { %474 = vrot.lane.b32.xlu1 %v469_v26, %s1027_s21  ;;  %471 = vrot.lane.b32.xlu0 %v469_v26, %s1028_s22  ;;  %s959_s21 = scalar_lea.vmem %s1201_s16, 128 }
 0x334   : > { %p960_p11 = scmp.ne.s32.totalorder %s1201_s16, %s959_s21 }
 0x336   : > { %p961_p12 = pnand %p960_p11, %p1117_p5 }
 0x337   : > { %477 = vrot.lane.b32.xlu0 %v469_v26, %s1029_s23 }
 0x338   : > { %p962_p13 = pneg %p961_p12 }
 0x33b   : > { %565 = vperm.xlu0 %958, %v562_v34  }
 0x3a5   : > { %v472_v27 = vpop.permute.xlu0 %471  ;;  %v475_v29 = vpop.permute.xlu1 %474 }
 0x3a6   : > { %v894_v28 = vpack.c.bf16 %v472_v27, %v467_v25 }
 0x3a8   : > { %896 = vmatpush3.bf16.msk.msra.mxu0 %vm895_vm9, %v894_v28 }
 0x3a9   : > { %v478_v30 = vpop.permute.xlu0 %477  ;;  %897 = vmatprep.subr.bf16.mxu0 %v1026_v5 }
 0x3aa   : > { %v898_v31 = vpack.c.bf16 %v478_v30, %v475_v29 }
 0x3ac   : > { %899 = vmatpush3.bf16.msra.mxu0 %v898_v31 }
 0x3ad   : > { %868 = vmatprep.subr.mxu0 %v1023_v0 }
 0x3af   : > { %866 = vmatmul.mubr.msk.f32.vlgmr.msra.gmra.mrb[2].mxu0 %vm480_vm10, %v461_v32 }
 0x3b0   : > { %869 = vmatpush3.msk.msra.mxu0 %vm280_vm1, %v1140_v2  ;;  %870 = vmatprep.mubr.msk.f32.mxu0 %vm1024_vm0, %v1023_v0 }
 0x3b1   : > { %900 = vmatprep.subr.bf16.mxu0 %v1026_v5 }
 0x3b3   : > { %871 = vmatmul.mubr.msk.f32.vlgmr.msra.gmra.mrb[4].mxu0 %vm276_vm2, %v561_v33 }
 0x3b4   : > { %877 = vmatprep.mubr.msk.f32.mxu0 %vm1024_vm0, %v1023_v0 }
 0x3ba   : > { %v566_v44 = vpop.permute.xlu0 %565 }
 0x482   : > { %v550_v36 = vpop.f32.mrb[2].mxu0 }
 0x483   : > { %v867_v37 = vpop.f32.mrb[3].mxu0  ;;  %v556_v38 = vsel %vm555_vm11, %v550_v36, 0.0 }
 0x484   : > { %558 = vrot.lane.b32.xlu1 %v556_v38, %s1028_s22  ;;  %s806_s22 = sshll.u32 %s1100_s28, 7  ;;  %s1038_s28 = smov [#allocation2]  }
 0x485   : > { %s1199_s19 = scalar_lea.hbm %s1249_s7, %s806_s22  ;;  %s963_s23 = sshll.u32 %s1038_s28, 4  ;;  %s964_s23 = int_to_ptr.vmem [resolvable:$false] %s963_s23 }
 0x486   : > { %v637_v42 = vpop.f32.mrb[4].mxu0  ;;  %s965_s29 = scalar_lea.vmem %s964_s23, 256  ;;  %p966_p0 = scmp.lt.s32.totalorder %s1201_s16, %s964_s23 }
 0x487   : > { %v872_v43 = vpop.f32.mrb[5].mxu0  ;;  %v638_v45 = vadd.f32 %v637_v42, %v566_v44  ;;  %p967_p1 = scmp.lt.s32.totalorder %s965_s29, %s959_s21 }
 0x489   : > { %v641_v46 = vmax.f32 %v638_v45, 0.0  ;;  %p968_p2 = por %p967_p1, %p966_p0 }
 0x48b   : > { %p969_p3 = pnand %p968_p2, %p962_p13 }
 0x4f6   : > { %v559_v39 = vpop.permute.xlu1 %558 }
 0x4f7   : > { %v901_v40 = vpack.c.bf16 %v559_v39, %v550_v36 }
 0x4f9   : > { %903 = vmatpush3.bf16.msk.msra.mxu0 %vm902_vm12, %v901_v40 }
 0x4fc   : > { %878 = vmatmul.mubr.msk.f32.vlgmr.msra.gmra.mrb[6].mxu0 %vm555_vm11, %v554_v41 }
 0x5cf   : > { %v711_v47 = vpop.f32.mrb[6].mxu0 }
 0x5d0   : > { %v712_v48 = vadd.f32 %v711_v47, %v641_v46  ;;  %v879_v49 = vpop.f32.mrb[7].mxu0 }
 0x5d2   : > { %715 = vst.msk [vmem:[%s269_s15] sm:$0xff] %vm555_vm11, %v712_v48 }
 0x5d3   : > { %972 = shalt.err (!%p969_p3)
}
 0x5d4   : > { %s973_s8 = scalar_lea.hbm %s1199_s19, 128  ;;  %s977_s14 = scalar_lea.hbm %s1249_s7, 256 }
 0x5d5   : > { %p974_p4 = scmp.ne.s32.totalorder %s1199_s19, %s973_s8  ;;  %p978_p9 = scmp.lt.u32.totalorder %s1199_s19, %s1249_s7 }
 0x5d6   : > { %p979_p10 = scmp.lt.u32.totalorder %s977_s14, %s973_s8  ;;  %p981_p12 = scmp.lt.u32.totalorder %s973_s8, %s1199_s19 }
 0x5d7   : > { %p975_p7 = pnand %p974_p4, %p1117_p5 }
 0x5d8   : > { %p980_p11 = por %p979_p10, %p978_p9 }
 0x5d9   : > { %p976_p8 = pneg %p975_p7 }
 0x5da   : > { %p982_p13 = por %p981_p12, %p980_p11 }
 0x5dc   : > { %p983_p0 = pnand %p982_p13, %p976_p8 }
 0x5de   : > { %986 = shalt.err (!%p983_p0)
}
 0x5df   : > { %904 = dma.vmem_to_hbm [thread:$0]  (%p1117_p5), %s1201_s16, 128, %s1199_s19, %s717_s20  }
 0x5e0 PF: > { %p910_p1 = scmp.ge.s32.totalorder %s1021_s27, 2  ;;  %s742_s17 = sand.u32 1, %s1009_s24  }
 0x5e1   : > { %s743_s18 = scalar_lea.sflag [#allocation3], %s742_s17 }
 0x5e2   : > { %p907_p2 = pnand %p910_p1, %p1121_p6 }
 0x5e4   : > { %1004 = dma.done.wait (!%p907_p2), %s743_s18, 128  }
 0x5e5   : > { %1006 = vsyncadd (!%p907_p2), %s743_s18, 4294967168  ;;  %p17_p3 = scmp.ge.s32.totalorder %s1104_s30, 4   ;;  %s1252_s24 = smov %s1013_s25 }
 0x5e6   : > { %s1253_s25 = smov %s1017_s26  ;;  %s1254_s26 = smov %s1115_s10 }
 0x5e7   : > { %s1255_s27 = smov %s1104_s30  ;;  %19 = sbr.rel (!%p17_p3) target bundleno = 3 (0x3), region = 83 }
 0x5ee   :  { %748 = vsyncpa [#allocation3], 1 }
 0x5ef   :  { %750 = vsyncpa [#allocation3 + $0x1], 1 }

</bundles_post_ra>
